<compile_context>
chip_gen: v7x
topology: tpu7x:2x2x1
jax: 0.10.0
libtpu: 0.0.40
codegen_flags: <defaults>
</compile_context>

<pallas_src>
import math

import jax
import jax.numpy as jnp
from jax.experimental import pallas as pl
from jax.experimental.pallas import tpu as pltpu


# --------------------------------------------------------------------------
# Tile-size selection
# --------------------------------------------------------------------------

_VMEM_BUDGET_BYTES = 10 * 1024 * 1024   # per-step double-buffered working set
_TARGET_PIXELS = 16 * 1024              # output pixels per grid step
_MIN_GRID_STEPS = 4                     # keep both v7x TensorCores busy


def _lcm(a, b):
    return a * b // math.gcd(a, b)


def _choose_row_tile(n, hh, wh, c1, cout):
    """Output rows per grid step for the fused kernel."""
    # VMEM cap: per output pixel we hold 4*c1 input + cout output f32 values,
    # each double-buffered by the software pipeline.
    per_pixel = (4 * c1 + cout) * 4 * 2
    max_pixels = max(128, _VMEM_BUDGET_BYTES // per_pixel)
    target_pixels = min(_TARGET_PIXELS, max_pixels)

    # th must keep the flattened output block lane-aligned (th*wh % 128 == 0)
    # and the input block sublane-aligned (2*th % 8 == 0), unless th == hh.
    need = 128 // math.gcd(wh, 128)
    th_mult = _lcm(8, need)
    if th_mult >= hh:
        return hh

    th = min(hh, max(th_mult, (target_pixels // max(wh, 1)) // th_mult * th_mult))

    # Megacore guard: for small batches make sure the grid has enough steps.
    if n < _MIN_GRID_STEPS:
        min_row_steps = min(-(-_MIN_GRID_STEPS // n), hh // th_mult)
        if min_row_steps > 1:
            cap = max(th_mult, (-(-hh // min_row_steps)) // th_mult * th_mult)
            th = min(th, cap)
    return th


def _choose_spatial_tile(n, m, cin, cout):
    """Flattened-spatial tile width for the unfused fallback kernel."""
    per_col = (cin + cout) * 4 * 2
    max_cols = max(512, _VMEM_BUDGET_BYTES // per_col)
    target = min(32 * 1024, max_cols)
    if m <= target:
        tm = m                       # whole extent (block == full dim is valid)
    else:
        tm = max(128, (target // 128) * 128)   # lane-dense multiple of 128
    if n < _MIN_GRID_STEPS and m > tm:
        min_steps = -(-_MIN_GRID_STEPS // n)
        cap = max(128, (-(-m // min_steps)) // 128 * 128)
        tm = min(tm, cap)
    return tm


# --------------------------------------------------------------------------
# Fused kernel: pixel-unshuffle + pointwise conv + BN + SiLU in one HBM pass
# --------------------------------------------------------------------------

def _fused_focus_kernel(w_ref, shift_ref, x_ref, o_ref):
    # w_ref     : (Cout, 4*c1)      BN-scale-folded 1x1-conv weight
    # shift_ref : (Cout, 1)         folded BN shift
    # x_ref     : (1, c1, 2*TH, W)  raw NCHW input rows for this tile
    # o_ref     : (1, Cout, TH*Wh)  NCHW-flat, lane-dense output tile
    x = x_ref[0]                                    # (c1, 2*TH, W)
    c1 = x.shape[0]

    # Space-to-depth inside VMEM: de-interleave even/odd rows (sublane stride-2)
    # then even/odd columns (lane stride-2).  Channel-block order matches
    # torch.cat((x[..., ::2, ::2], x[..., 1::2, ::2],
    #            x[..., ::2, 1::2], x[..., 1::2, 1::2]), 1).
    x_er = x[:, 0::2, :]                            # even rows (c1, TH, W)
    x_or = x[:, 1::2, :]                            # odd rows  (c1, TH, W)
    x_cat = jnp.concatenate(
        (x_er[:, :, 0::2], x_or[:, :, 0::2], x_er[:, :, 1::2], x_or[:, :, 1::2]),
        axis=0,
    )                                               # (4*c1, TH, Wh)
    th, wh = x_cat.shape[1], x_cat.shape[2]
    rhs = x_cat.reshape(4 * c1, th * wh)            # (4*c1, TH*Wh)

    acc = jnp.dot(w_ref[...], rhs, preferred_element_type=jnp.float32)
    y = acc + shift_ref[...]
    # SiLU epilogue in f32 (EUP/VPU work is hidden under the HBM-bound DMA).
    o_ref[0] = (y * jax.nn.sigmoid(y)).astype(o_ref.dtype)


def _focus_fused(x, w_folded, shift):
    n, c1, h, w_in = x.shape
    hh, wh = h // 2, w_in // 2
    cout = w_folded.shape[0]
    th = _choose_row_tile(n, hh, wh, c1, cout)
    grid = (n, pl.cdiv(hh, th))

    out = pl.pallas_call(
        _fused_focus_kernel,
        out_shape=jax.ShapeDtypeStruct((n, cout, hh * wh), x.dtype),
        grid=grid,
        in_specs=[
            pl.BlockSpec((cout, 4 * c1), lambda b, i: (0, 0)),     # weight (resident)
            pl.BlockSpec((cout, 1), lambda b, i: (0, 0)),          # BN shift (resident)
            pl.BlockSpec((1, c1, 2 * th, w_in), lambda b, i: (b, 0, i, 0)),
        ],
        out_specs=pl.BlockSpec((1, cout, th * wh), lambda b, i: (b, 0, i)),
        compiler_params=pltpu.CompilerParams(
            dimension_semantics=("parallel", "parallel"),
            vmem_limit_bytes=32 * 1024 * 1024,
        ),
    )(w_folded, shift, x)
    return out.reshape(n, cout, hh, wh)             # free reshape -> NCHW


# --------------------------------------------------------------------------
# Unfused fallback: XLA space-to-depth + lane-dense pointwise kernel
# --------------------------------------------------------------------------

def _pointwise_kernel(w_ref, shift_ref, x_ref, o_ref):
    # w_ref: (Cout, Cin), shift_ref: (Cout, 1), x_ref: (1, Cin, TM), o_ref: (1, Cout, TM)
    acc = jnp.dot(w_ref[...], x_ref[0], preferred_element_type=jnp.float32)
    y = acc + shift_ref[...]
    o_ref[0] = (y * jax.nn.sigmoid(y)).astype(o_ref.dtype)


def _focus_unfused(x, w_folded, shift):
    # Materialized space-to-depth (one extra HBM round trip); only used when the
    # fused kernel cannot be lowered on this Mosaic build.
    x_cat = jnp.concatenate(
        (x[..., ::2, ::2], x[..., 1::2, ::2], x[..., ::2, 1::2], x[..., 1::2, 1::2]),
        axis=1,
    )                                               # (N, 4*c1, H/2, W/2)
    n, cin, hh, wh = x_cat.shape
    cout = w_folded.shape[0]
    m = hh * wh
    x3 = x_cat.reshape(n, cin, m)
    tm = _choose_spatial_tile(n, m, cin, cout)

    out = pl.pallas_call(
        _pointwise_kernel,
        out_shape=jax.ShapeDtypeStruct((n, cout, m), x3.dtype),
        grid=(n, pl.cdiv(m, tm)),
        in_specs=[
            pl.BlockSpec((cout, cin), lambda b, i: (0, 0)),
            pl.BlockSpec((cout, 1), lambda b, i: (0, 0)),
            pl.BlockSpec((1, cin, tm), lambda b, i: (b, 0, i)),
        ],
        out_specs=pl.BlockSpec((1, cout, tm), lambda b, i: (b, 0, i)),
        compiler_params=pltpu.CompilerParams(
            dimension_semantics=("parallel", "parallel"),
            vmem_limit_bytes=32 * 1024 * 1024,
        ),
    )(w_folded, shift, x3)
    return out.reshape(n, cout, hh, wh)


# --------------------------------------------------------------------------
# Public forward (PyTorch Focus eval-mode semantics)
# --------------------------------------------------------------------------

_FUSED_STATE = {"ok": None}   # cache: can the fused kernel lower on this build?


def focus_forward(x_nchw, w, gamma, beta, running_mean, running_var, eps=1e-5):
    """Focus.forward (eval mode): stride-2 pixel unshuffle, then
    Conv(4*c1 -> c2, k=1, bias=False) + folded BatchNorm + SiLU.

    `w` is expected as [Cin=4*c1, Cout] (PyTorch's [Cout, Cin, 1, 1] weight
    reshaped + transposed).  Input/output are NCHW, matching PyTorch.
    """
    n, c1, h, w_in = x_nchw.shape
    assert h % 2 == 0 and w_in % 2 == 0, "Focus needs even H and W"
    cin = 4 * c1
    cout = w.shape[1]
    assert w.shape[0] == cin, "weight must be [Cin=4*c1, Cout]"

    # Fold eval-mode BatchNorm: scale into the weight, shift kept separate.
    scale = gamma / jnp.sqrt(running_var + eps)            # (Cout,)
    w_folded = (w * scale[None, :]).T                      # (Cout, Cin)
    shift = (beta - running_mean * scale).reshape(cout, 1)  # (Cout, 1)

    if _FUSED_STATE["ok"] is None:
        try:
            out = jax.block_until_ready(_focus_fused(x_nchw, w_folded, shift))
            _FUSED_STATE["ok"] = True
            return out
        except Exception:
            # In-kernel strided de-interleave not supported by this Mosaic
            # build -> fall back to the unfused (materialized) path.
            _FUSED_STATE["ok"] = False
    if _FUSED_STATE["ok"]:
        return _focus_fused(x_nchw, w_folded, shift)
    return _focus_unfused(x_nchw, w_folded, shift)


# --------------------------------------------------------------------------
# Pure-JAX reference (PyTorch eval-mode Focus forward)
# --------------------------------------------------------------------------

def _reference(x_nchw, w, gamma, beta, running_mean, running_var, eps=1e-5):
    x_cat = jnp.concatenate(
        (
            x_nchw[..., ::2, ::2],
            x_nchw[..., 1::2, ::2],
            x_nchw[..., ::2, 1::2],
            x_nchw[..., 1::2, 1::2],
        ),
        axis=1,
    )
    y = jnp.einsum("nchw,co->nohw", x_cat, w)
    scale = gamma / jnp.sqrt(running_var + eps)
    shift = beta - running_mean * scale
    y = y * scale[None, :, None, None] + shift[None, :, None, None]
    return y * jax.nn.sigmoid(y)


if __name__ == "__main__":
    # Focus(c1=4, c2=8, k=1) on a [2, 4, 16, 16] NCHW input.
    N, c1, H, W = 2, 4, 16, 16
    c2 = 8
    Cin = 4 * c1

    key = jax.random.PRNGKey(0)
    kx, kw, kg, kb, km, kv = jax.random.split(key, 6)

    x = jax.random.normal(kx, (N, c1, H, W), dtype=jnp.float32)
    # Conv2d(16, 8, k=1, bias=False) weight [Cout, Cin, 1, 1] stored as [Cin, Cout].
    w = jax.random.normal(kw, (Cin, c2), dtype=jnp.float32) * 0.1
    # BatchNorm2d(8) parameters / running stats (eval-mode semantics).
    gamma = 1.0 + 0.1 * jax.random.normal(kg, (c2,), dtype=jnp.float32)
    beta = 0.1 * jax.random.normal(kb, (c2,), dtype=jnp.float32)
    running_mean = 0.1 * jax.random.normal(km, (c2,), dtype=jnp.float32)
    running_var = jnp.abs(1.0 + 0.1 * jax.random.normal(kv, (c2,), dtype=jnp.float32))

    out = focus_forward(x, w, gamma, beta, running_mean, running_var)
    out = jax.block_until_ready(out)

    ref = _reference(x, w, gamma, beta, running_mean, running_var)
    assert out.shape == (N, c2, H // 2, W // 2), out.shape
    assert jnp.allclose(out, ref, atol=1e-5, rtol=1e-5), float(
        jnp.max(jnp.abs(out - ref))
    )

    print("KERNEL_OK")
</pallas_src>

<mosaic_0001>
module attributes {stable_mosaic.version = 11 : i64} {
  func.func @_pointwise_kernel(%arg0: i32, %arg1: i32, %arg2: memref<8x16xf32, #tpu.memory_space<vmem>>, %arg3: memref<8x1xf32, #tpu.memory_space<vmem>>, %arg4: memref<1x16x64xf32, #tpu.memory_space<vmem>>, %arg5: memref<1x8x64xf32, #tpu.memory_space<vmem>>) attributes {dimension_semantics = [#tpu.dimension_semantics<parallel>, #tpu.dimension_semantics<parallel>], iteration_bounds = array<i64: 2, 1>, scalar_prefetch = 0 : i64, scratch_operands = 0 : i64, tpu.core_type = #tpu.core_type<tc>, window_params = [{pipeline_mode = #tpu.pipeline_mode<synchronous>, transform_indices = @transform_0, window_bounds = array<i64: 8, 16>}, {pipeline_mode = #tpu.pipeline_mode<synchronous>, transform_indices = @transform_1, window_bounds = array<i64: 8, 1>}, {transform_indices = @transform_2, window_bounds = array<i64: 1, 16, 64>}, {transform_indices = @transform_3, window_bounds = array<i64: 1, 8, 64>}]} {
    %c0 = arith.constant 0 : index
    %c0_0 = arith.constant 0 : index
    %0 = vector.load %arg2[%c0, %c0_0] : memref<8x16xf32, #tpu.memory_space<vmem>>, vector<8x16xf32>
    %c0_1 = arith.constant 0 : index
    %c0_2 = arith.constant 0 : index
    %c0_3 = arith.constant 0 : index
    %1 = vector.load %arg4[%c0_1, %c0_2, %c0_3] : memref<1x16x64xf32, #tpu.memory_space<vmem>>, vector<1x16x64xf32>
    %2 = vector.shape_cast %1 : vector<1x16x64xf32> to vector<16x64xf32>
    %cst = arith.constant dense<0.000000e+00> : vector<8x64xf32>
    %3 = tpu.matmul %0, %2, %cst {dimension_numbers = #tpu.dot_dimension_numbers<[1], [0], [0], [1], [0, 0, 1, 1], [], []>} : vector<8x16xf32>, vector<16x64xf32>, vector<8x64xf32> -> vector<8x64xf32>
    %c0_4 = arith.constant 0 : index
    %c0_5 = arith.constant 0 : index
    %4 = vector.load %arg3[%c0_4, %c0_5] : memref<8x1xf32, #tpu.memory_space<vmem>>, vector<8x1xf32>
    %5 = vector.broadcast %4 : vector<8x1xf32> to vector<8x64xf32>
    %6 = arith.addf %3, %5 : vector<8x64xf32>
    %7 = arith.negf %6 : vector<8x64xf32>
    %8 = math.exp %7 : vector<8x64xf32>
    %cst_6 = arith.constant 1.000000e+00 : f32
    %9 = vector.broadcast %cst_6 : f32 to vector<8x64xf32>
    %10 = arith.addf %9, %8 : vector<8x64xf32>
    %11 = arith.divf %9, %10 : vector<8x64xf32>
    %12 = arith.mulf %6, %11 : vector<8x64xf32>
    %c0_7 = arith.constant 0 : index
    %c0_8 = arith.constant 0 : index
    %c0_9 = arith.constant 0 : index
    %13 = vector.load %arg5[%c0_7, %c0_8, %c0_9] : memref<1x8x64xf32, #tpu.memory_space<vmem>>, vector<1x8x64xf32>
    %14 = vector.shape_cast %13 : vector<1x8x64xf32> to vector<8x64xf32>
    %15 = vector.shape_cast %12 : vector<8x64xf32> to vector<1x8x64xf32>
    tpu.vector_store %arg5[%c0_7, %c0_8, %c0_9], %15 {strides = array<i32>} : memref<1x8x64xf32, #tpu.memory_space<vmem>>, vector<1x8x64xf32>,
    return
  }
  func.func @transform_0(%arg0: i32, %arg1: i32) -> (i32, i32) {
    %c0_i32 = arith.constant 0 : i32
    %c0_i32_0 = arith.constant 0 : i32
    %c0_i32_1 = arith.constant 0 : i32
    return %c0_i32, %c0_i32_0 : i32, i32
  }
  func.func @transform_1(%arg0: i32, %arg1: i32) -> (i32, i32) {
    %c0_i32 = arith.constant 0 : i32
    %c0_i32_0 = arith.constant 0 : i32
    %c0_i32_1 = arith.constant 0 : i32
    return %c0_i32, %c0_i32_0 : i32, i32
  }
  func.func @transform_2(%arg0: i32, %arg1: i32) -> (i32, i32, i32) {
    %c0_i32 = arith.constant 0 : i32
    %c0_i32_0 = arith.constant 0 : i32
    return %arg0, %c0_i32, %arg1 : i32, i32, i32
  }
  func.func @transform_3(%arg0: i32, %arg1: i32) -> (i32, i32, i32) {
    %c0_i32 = arith.constant 0 : i32
    %c0_i32_0 = arith.constant 0 : i32
    return %arg0, %c0_i32, %arg1 : i32, i32, i32
  }
}

</mosaic_0001>

<bundles_post_ra>
// kernel: tpu_custom_call.1
= control target key start
LH: loop header
LB: loop body
LE: loop exit
PB: predicated region body
PF: predicated region fallthrough
CT: control target
= control target key end

     0   :  { %8 = vsyncpa [#allocation3], 0  ;;  %s819_s0 = inlined_call_operand.vmem [shape: f32[8,16], index: 0, kind: input, shape index: {}]   ;;  %s820_s1 = inlined_call_operand.vmem [shape: f32[8,1], index: 1, kind: input, shape index: {}]   ;;  %s821_s2 = inlined_call_operand.hbm [shape: f32[2,16,64], index: 2, kind: input, shape index: {}]   ;;  %s822_s3 = inlined_call_operand.hbm [shape: f32[2,8,64], index: 3, kind: output, shape index: {}]  }
   0x1   :  { %10 = vsyncpa [#allocation3 + $0x1], 0 }
   0x2   :  { %11 = vsyncpa [#allocation4], 0 }
   0x3   :  { %13 = vsyncpa [#allocation4 + $0x1], 0  ;;  %s639_s12 = smov 0   ;;  %s641_s13 = smov 0  }
   0x4   :  { %s643_s14 = smov 0   ;;  %s645_s15 = smov 0  }
   0x5   :  { %s647_s16 = smov 0   ;;  %s649_s17 = smov 0  }
   0x6 LB: > { %s394_s18 = sadd.s32 4294967295, %s609_s17   ;;  %s395_s19 = sadd.s32 4294967294, %s609_s17   ;;  %s609_s17 = sphi %s649_s17, %s19_s17   ;;  %s605_s16 = sphi %s647_s16, %s837_s16   ;;  %s601_s15 = sphi %s645_s15, %s836_s15   ;;  %s597_s14 = sphi %s643_s14, %s835_s14   ;;  %s593_s13 = sphi %s641_s13, %s834_s13   ;;  %s589_s12 = sphi %s639_s12, %s833_s12  }
   0x7   : > { %s31_s20 = sadd.s32 1, %s605_s16  ;;  %s82_s21 = sadd.s32 1, %s597_s14 }
   0x8   : > { %p33_p0 = scmp.ge.s32.totalorder %s31_s20, 2  ;;  %p89_p1 = scmp.ne.s32.totalorder %s597_s14, %s593_s13 }
   0x9   : > { %p90_p2 = scmp.eq.s32.totalorder %s609_s17, 0  ;;  %p95_p3 = scmp.ne.s32.totalorder %s593_s13, %s589_s12 }
   0xa   : > { %s839_s20 = smov (%p33_p0, %s31_s20), 0  ;;  %p96_p5 = scmp.eq.s32.totalorder %s394_s18, 0 }
   0xb   : > { %p680_p4 = por %p90_p2, %p89_p1  ;;  %s77_s23 = ssub.s32 %s605_s16, %s839_s20 }
   0xc   : > { %p121_p6 = scmp.eq.s32.totalorder %s394_s18, 1  ;;  %p80_p7 = scmp.eq.s32.totalorder %s77_s23, 0 }
   0xd   : > { %p686_p8 = por %p96_p5, %p95_p3  ;;  %p127_p10 = scmp.eq.s32.totalorder %s395_s19, 1 }
   0xe   : > { %p690_p9 = por %p121_p6, %p89_p1  ;;  %p436_p13 = scmp.lt.s32.totalorder %s609_s17, 2 }
   0xf   : > { %s695_s26 = scalar_select %p80_p7, %s597_s14, %s82_s21  }
  0x10   : > { %s826_s25 = scalar_select %p690_p9, 1, 0 }
  0x11   : > { %p697_p11 = por %p127_p10, %p95_p3  ;;  %s153_s28 = sand.u32 1, %s597_s14  }
  0x12   : > { %s398_s29 = sshll.u32 %s153_s28, 4  ;;  %s410_s30 = sshll.u32 %s605_s16, 8 }
  0x13   : > { %s827_s27 = scalar_select %p697_p11, 1, 0 }
  0x14   : > { %s708_s6 = scalar_lea.hbm %s821_s2, %s410_s30  ;;  %s157_s7 = scalar_lea.vmem [#allocation2], %s398_s29 }
  0x15   : > { %s165_s8 = sshll.u32 %s157_s7, 4  ;;  %p714_p0 = pnand %p436_p13, %p680_p4  ;;  %s710_s8 = int_to_ptr.vmem [resolvable:$true] %s165_s8 }
  0x16   : > { %s719_s10 = scalar_lea.sflag [#allocation3], %s153_s28  ;;  %s497_s11 = scalar_lea.hbm %s708_s6, 256 }
  0x17   : > { %p498_p2 = scmp.ne.s32.totalorder %s708_s6, %s497_s11  ;;  %p499_p3 = pneg %p714_p0 }
  0x18   : > { %s502_s21 = scalar_lea.hbm %s821_s2, 512  ;;  %p503_p4 = scmp.lt.u32.totalorder %s708_s6, %s821_s2 }
  0x19   : > { %p500_p5 = pnand %p499_p3, %p498_p2  ;;  %p504_p7 = scmp.lt.u32.totalorder %s502_s21, %s497_s11 }
  0x1a   : > { %p506_p13 = scmp.lt.u32.totalorder %s497_s11, %s708_s6 }
  0x1b   : > { %p501_p6 = pneg %p500_p5  ;;  %p505_p10 = por %p504_p7, %p503_p4 }
  0x1d   : > { %p507_p12 = por %p506_p13, %p505_p10 }
  0x1f   : > { %p508_p1 = pnand %p507_p12, %p501_p6 }
  0x21   : > { %511 = shalt.err (!%p508_p1)
}
  0x22   : > { %s512_s28 = scalar_lea.vmem %s710_s8, 256  ;;  %s611_s29 = smov [#allocation2]  }
  0x23   : > { %p513_p2 = scmp.ne.s32.totalorder %s710_s8, %s512_s28  ;;  %s517_s30 = sshll.u32 %s611_s29, 4  ;;  %s518_s30 = int_to_ptr.vmem [resolvable:$false] %s517_s30 }
  0x24   : > { %s519_s4 = scalar_lea.vmem %s518_s30, 512  ;;  %p520_p9 = scmp.lt.s32.totalorder %s710_s8, %s518_s30 }
  0x25   : > { %p515_p5 = pnand %p513_p2, %p499_p3  ;;  %p521_p4 = scmp.lt.s32.totalorder %s519_s4, %s512_s28 }
  0x27   : > { %p516_p11 = pneg %p515_p5  ;;  %p522_p7 = por %p521_p4, %p520_p9 }
  0x29   : > { %p523_p10 = pnand %p522_p7, %p516_p11 }
  0x2b   : > { %526 = shalt.err (!%p523_p10)
}
  0x2c   : > { %s612_s5 = smov 128   ;;  %s613_s7 = smov 8  }
  0x2d   : > { %431 = dma.hbm_to_vmem [thread:$0]  (!%p714_p0), %s708_s6, 256, %s710_s8, %s719_s10, %s612_s5, %s612_s5, %s613_s7  }
  0x2e   : > { %p173_p12 = scmp.lt.s32.totalorder %s609_s17, 3  ;;  %p829_p1 = scmp.ge.s32.totalorder %s609_s17, 1 }
  0x30   : > { %p174_p3 = pnand %p829_p1, %p173_p12 }
  0x31   : > { %s751_s11 = sand.u32 (!%p174_p3), 1, %s593_s13  }
  0x32   : > { %177 = sbr.rel (%p174_p3) target bundleno = 321 (0x141), region = 32  ;;  %s402_s18 = sshll.u32 (!%p174_p3), %s751_s11, 4 }
  0x33   : > { %s180_s19 = scalar_lea.sflag (!%p174_p3), [#allocation3], %s751_s11  ;;  %s183_s21 = scalar_lea.vmem (!%p174_p3), [#allocation2], %s402_s18 }
  0x39   : > { %580 = dma.done.wait (%p686_p8), %s180_s19, 256  }
  0x3a   : > { %582 = vsyncadd (%p686_p8), %s180_s19, 4294967040  ;;  %v614_v0 = vmov 0.0|0.0   ;;  %vm615_vm0 = vmmov 0   ;;  %v616_v1 = vmov 0.0   ;;  %v617_v2 = vmov 0   ;;  %v207_v3 = vld [vmem:[%s183_s21] sm:$0xff] }
  0x3b   : > { %421 = vmatprep.subr.bf16.mxu0 %v614_v0  ;;  %418 = vmatprep.mubr.msk.f32.mxu0 %vm615_vm0, %v616_v1  ;;  %v208_v4 = vld [vmem:[%s183_s21 + $0x8] sm:$0xff]  ;;  %v209_v6 = vld [vmem:[%s820_s1] sm:$0xff]  ;;  %vm215_vm1 = vcmask 130048   ;;  %s403_s10 = sshll.u32 %s751_s11, 3  ;;  %s407_s22 = sshll.u32 %s601_s15, 7  ;;  %vm296_vm2 = vcmask 523264  }
  0x3c   : > { %492 = vset.pattern.permute.xlu0 %v617_v2  ;;  %v422_v5 = vpack.c.bf16 %v208_v4, %v207_v3  ;;  %v206_v7 = vld [vmem:[%s819_s0] sm:$0xff]  ;;  %s205_s23 = scalar_lea.vmem [#allocation5], %s403_s10  ;;  %s770_s4 = scalar_lea.hbm %s822_s3, %s407_s22 }
  0x3d   : > { %212 = vperm.xlu0 %492, %v209_v6   ;;  %s313_s28 = sshll.u32 %s205_s23, 4  ;;  %s299_s5 = scalar_lea.sflag [#allocation4], %s751_s11  ;;  %s772_s28 = int_to_ptr.vmem [resolvable:$true] %s313_s28 }
  0x3e   : > { %423 = vmatpush3.bf16.msra.mxu0 %v422_v5  ;;  %s527_s7 = scalar_lea.vmem %s772_s28, 128  ;;  %p830_p9 = scmp.ne.s32.totalorder %s826_s25, 0 }
  0x3f   : > { %p528_p8 = scmp.ne.s32.totalorder %s772_s28, %s527_s7  ;;  %s618_s15 = smov [#allocation5]  }
  0x40   : > { %s531_s18 = sshll.u32 %s618_s15, 4  ;;  %s532_s18 = int_to_ptr.vmem [resolvable:$false] %s531_s18 }
  0x41   : > { %419 = vmatmul.mubr.msk.f32.vlgmr.msra.gmra.mrb[0].mxu0 %vm215_vm1, %v206_v7  ;;  %p529_p11 = pnand %p528_p8, %p830_p9  ;;  %s533_s19 = scalar_lea.vmem %s532_s18, 256 }
  0x42   : > { %p534_p6 = scmp.lt.s32.totalorder %s772_s28, %s532_s18  ;;  %p535_p13 = scmp.lt.s32.totalorder %s533_s19, %s527_s7 }
  0x43   : > { %p530_p0 = pneg %p529_p11 }
  0x44   : > { %p536_p2 = por %p535_p13, %p534_p6 }
  0x46   : > { %p537_p5 = pnand %p536_p2, %p530_p0 }
  0xbc   : > { %v213_v8 = vpop.permute.xlu0 %212 }
 0x114   : > { %v285_v9 = vpop.f32.mrb[0].mxu0 }
 0x115   : > { %v286_v10 = vadd.f32 %v285_v9, %v213_v8  ;;  %v420_v11 = vpop.f32.mrb[1].mxu0 }
 0x117   : > { %v405_v12 = vmul.f32 -1.442695, %v286_v10 }
 0x119   : > { %493 = vpow2.f32 %v405_v12 }
 0x123   : > { %v494_v13 = vpop.eup %493 }
 0x124   : > { %v292_v14 = vadd.f32 1.0, %v494_v13 }
 0x126   : > { %495 = vrcp.f32 %v292_v14 }
 0x130   : > { %v496_v15 = vpop.eup %495 }
 0x131   : > { %v295_v16 = vmul.f32 %v496_v15, %v286_v10 }
 0x133   : > { %297 = vst.msk [vmem:[%s205_s23] sm:$0xff] %vm296_vm2, %v295_v16 }
 0x134   : > { %540 = shalt.err (!%p537_p5)
}
 0x135   : > { %s541_s11 = scalar_lea.hbm %s770_s4, 128  ;;  %s545_s8 = scalar_lea.hbm %s822_s3, 256 }
 0x136   : > { %p542_p4 = scmp.ne.s32.totalorder %s770_s4, %s541_s11  ;;  %p546_p12 = scmp.lt.u32.totalorder %s770_s4, %s822_s3 }
 0x137   : > { %p547_p1 = scmp.lt.u32.totalorder %s545_s8, %s541_s11  ;;  %p549_p8 = scmp.lt.u32.totalorder %s541_s11, %s770_s4 }
 0x138   : > { %p543_p7 = pnand %p542_p4, %p830_p9 }
 0x139   : > { %p548_p3 = por %p547_p1, %p546_p12 }
 0x13a   : > { %p544_p10 = pneg %p543_p7 }
 0x13b   : > { %p550_p11 = por %p549_p8, %p548_p3 }
 0x13d   : > { %p551_p0 = pnand %p550_p11, %p544_p10 }
 0x13f   : > { %554 = shalt.err (!%p551_p0)
}
 0x140   : > { %426 = dma.vmem_to_hbm [thread:$0]  (%p830_p9), %s772_s28, 128, %s770_s4, %s299_s5  }
 0x141 PF: > { %s325_s10 = sand.u32 1, %s589_s12   ;;  %p831_p6 = scmp.ne.s32.totalorder %s827_s27, 0 }
 0x142   : > { %p832_p13 = scmp.ge.s32.totalorder %s609_s17, 2  ;;  %s326_s22 = scalar_lea.sflag [#allocation4], %s325_s10 }
 0x144   : > { %p433_p2 = pnand %p832_p13, %p831_p6 }
 0x146   : > { %584 = dma.done.wait (!%p433_p2), %s326_s22, 128  }
 0x147   : > { %586 = vsyncadd (!%p433_p2), %s326_s22, 4294967168  ;;  %s19_s17 = sadd.s32 1, %s609_s17   ;;  %s833_s12 = smov %s593_s13 }
 0x148   : > { %p16_p5 = scmp.ge.s32.totalorder %s19_s17, 4   ;;  %s834_s13 = smov %s597_s14 }
 0x149   : > { %s835_s14 = smov %s695_s26  ;;  %s836_s15 = smov %s605_s16 }
 0x14a   : > { %s837_s16 = smov %s839_s20  ;;  %18 = sbr.rel (!%p16_p5) target bundleno = 6 (0x6), region = 77 }
 0x151   :  { %331 = vsyncpa [#allocation3], 1 }
 0x152   :  { %333 = vsyncpa [#allocation3 + $0x1], 1 }
 0x153   :  { %334 = vsyncpa [#allocation4], 1 }
 0x154   :  { %336 = vsyncpa [#allocation4 + $0x1], 1 }

</bundles_post_ra>
